<compile_context>
chip_gen: v6e
topology: v6e:2x2x1
jax: 0.10.0
libtpu: 0.0.40
codegen_flags: <defaults>
</compile_context>

<pallas_src>
import functools

import numpy as np
import jax
import jax.numpy as jnp
from jax import lax
from jax.experimental import pallas as pl
from jax.experimental.pallas import tpu as pltpu

_INV_SQRT2 = 0.7071067811865476


def _gelu(v):
    # exact (erf-based) GELU == torch.nn.GELU() default
    return 0.5 * v * (1.0 + lax.erf(v * _INV_SQRT2))


def _round_up(x, m):
    return ((x + m - 1) // m) * m


def _mlp_kernel(x_ref, w1_ref, b1_ref, w2_ref, b2_ref, w3_ref, b3_ref, o_ref):
    dot = functools.partial(jnp.dot, preferred_element_type=jnp.float32)
    cd = w1_ref.dtype  # compute dtype (bf16 by default), MXU-native

    h = _gelu(dot(x_ref[...], w1_ref[...]) + b1_ref[...])          # (tm, h1p) f32
    h = _gelu(dot(h.astype(cd), w2_ref[...]) + b2_ref[...])        # (tm, h2p) f32
    o = dot(h.astype(cd), w3_ref[...]) + b3_ref[...]               # (tm, n_class) f32
    o_ref[...] = o.astype(o_ref.dtype)
    # TODO(synk): dropout (p=0.0 default / eval mode) is the identity; omitted.


def mlp_forward(x, params, *, block_rows=512, compute_dtype=jnp.bfloat16):
    """Mlp forward. x: (..., in_features). Returns (..., n_class) float32."""
    *lead, d = x.shape
    rows = int(np.prod(lead)) if lead else 1
    x2d = x.reshape(rows, d).astype(compute_dtype)

    w1, b1 = params["w1"], params["b1"]
    w2, b2 = params["w2"], params["b2"]
    w3, b3 = params["w3"], params["b3"]
    h1, h2 = w1.shape[1], w2.shape[1]
    n_class = w3.shape[1]

    # Lane-dense hidden dims: zero-pad h1/h2 up to multiples of 128.
    # GELU(0) == 0 and the padded w2/w3 rows are zero => math unchanged.
    h1p = _round_up(h1, 128)
    h2p = _round_up(h2, 128)
    if h1p != h1:
        w1 = jnp.pad(w1, ((0, 0), (0, h1p - h1)))
        b1 = jnp.pad(b1, ((0, 0), (0, h1p - h1)))
        w2 = jnp.pad(w2, ((0, h1p - h1), (0, 0)))
    if h2p != h2:
        w2 = jnp.pad(w2, ((0, 0), (0, h2p - h2)))
        b2 = jnp.pad(b2, ((0, 0), (0, h2p - h2)))
        w3 = jnp.pad(w3, ((0, h2p - h2), (0, 0)))

    # bf16 weights halve the HBM weight-read traffic; biases stay f32 (added to
    # the f32 MXU accumulators).
    w1 = w1.astype(compute_dtype)
    w2 = w2.astype(compute_dtype)
    w3 = w3.astype(compute_dtype)
    b1 = b1.astype(jnp.float32)
    b2 = b2.astype(jnp.float32)
    b3 = b3.astype(jnp.float32)

    # Row tiling: at least 2 grid steps whenever rows > 8 (v7x has 2 TCs and
    # pipelining needs >=2 steps), tile right-sized to rows so padding is small.
    target_steps = max(2, pl.cdiv(rows, block_rows))
    tm = max(8, _round_up(pl.cdiv(rows, target_steps), 8))

    # VMEM budgeting (cap 48 MiB: safe under v7x's 64 MiB physical VMEM).
    cbytes = jnp.dtype(compute_dtype).itemsize
    w_bytes = (d * h1p + h1p * h2p + h2p * n_class) * cbytes \
              + (h1p + h2p + n_class) * 4
    # Single-buffer the grid-invariant weights only when doubling them would
    # meaningfully eat VMEM (large in_features); they are never re-DMA'd.
    single_buffer_w = 2 * w_bytes > 8 * 1024 * 1024
    budget = 48 * 1024 * 1024

    def est_bytes(tm_):
        io = 2 * (tm_ * d * cbytes + tm_ * n_class * 4)   # double-buffered x/out tiles
        act = tm_ * (h1p + h2p) * 4                        # f32 intermediates
        wf = 1 if single_buffer_w else 2
        return io + wf * w_bytes + act + (2 << 20)         # + slack

    while est_bytes(tm) > budget and tm > 8:
        tm = max(8, _round_up(tm // 2, 8))

    grid = pl.cdiv(rows, tm)
    rows_p = grid * tm
    if rows_p != rows:
        x2d = jnp.pad(x2d, ((0, rows_p - rows), (0, 0)))

    vmem_limit = int(min(budget, max(32 * 1024 * 1024, est_bytes(tm))))

    def const_spec(shape):
        if single_buffer_w:
            return pl.BlockSpec(shape, lambda i: (0, 0), pipeline_mode=pl.Buffered(1))
        return pl.BlockSpec(shape, lambda i: (0, 0))

    out2d = pl.pallas_call(
        _mlp_kernel,
        out_shape=jax.ShapeDtypeStruct((rows_p, n_class), jnp.float32),
        grid=(grid,),
        in_specs=[
            pl.BlockSpec((tm, d), lambda i: (i, 0)),   # x row tile
            const_spec((d, h1p)), const_spec((1, h1p)),        # fc1
            const_spec((h1p, h2p)), const_spec((1, h2p)),      # fc2
            const_spec((h2p, n_class)), const_spec((1, n_class)),  # fc3
        ],
        # Unpadded output block: minor dim equals the full array extent, so the
        # BlockSpec is legal and we avoid writing 128/n_class x the needed bytes.
        out_specs=pl.BlockSpec((tm, n_class), lambda i: (i, 0)),
        compiler_params=pltpu.CompilerParams(
            dimension_semantics=("parallel",),
            vmem_limit_bytes=vmem_limit,
        ),
    )(x2d, w1, b1, w2, b2, w3, b3)

    return out2d[:rows].reshape(*lead, n_class)


def init_params(key, in_features, n_class):
    """Deterministic synthetic parameters (shapes match the PyTorch module)."""
    h1 = in_features // 4
    h2 = in_features // 16
    ks = jax.random.split(key, 6)
    f32 = jnp.float32

    def w(k, shape, fan_in):
        return (jax.random.normal(k, shape, f32) / np.sqrt(fan_in)).astype(f32)

    return {
        "w1": w(ks[0], (in_features, h1), in_features),
        "b1": 0.1 * jax.random.normal(ks[1], (1, h1), f32),
        "w2": w(ks[2], (h1, h2), h1),
        "b2": 0.1 * jax.random.normal(ks[3], (1, h2), f32),
        "w3": w(ks[4], (h2, n_class), h2),
        "b3": 0.1 * jax.random.normal(ks[5], (1, n_class), f32),
    }


def reference_forward(x, p):
    """Pure-JAX f32 HIGHEST-precision reference mirroring the PyTorch forward."""
    hp = lax.Precision.HIGHEST
    h = _gelu(jnp.matmul(x, p["w1"], precision=hp) + p["b1"])
    h = _gelu(jnp.matmul(h, p["w2"], precision=hp) + p["b2"])
    return jnp.matmul(h, p["w3"], precision=hp) + p["b3"]


def reference_matched(x, p, compute_dtype):
    """Reference using the same bf16-input / f32-accumulate recipe as the kernel."""
    cd = compute_dtype
    f32 = jnp.float32
    dot = functools.partial(jnp.dot, preferred_element_type=f32)
    h = _gelu(dot(x.astype(cd), p["w1"].astype(cd)) + p["b1"])
    h = _gelu(dot(h.astype(cd), p["w2"].astype(cd)) + p["b2"])
    return dot(h.astype(cd), p["w3"].astype(cd)) + p["b3"]


if __name__ == "__main__":
    key = jax.random.PRNGKey(0)
    fwd = jax.jit(mlp_forward)

    # Two small shapes: the original test shape, plus one exercising ragged rows,
    # a non-128-multiple in_features, and hidden-dim padding.
    for (B, S, D, n_class) in [(2, 8, 128, 10), (3, 7, 192, 5)]:
        kx, kp = jax.random.split(jax.random.fold_in(key, D))
        x = jax.random.normal(kx, (B, S, D), jnp.float32)
        params = init_params(kp, D, n_class)

        out = jax.block_until_ready(fwd(x, params))
        assert out.shape == (B, S, n_class), out.shape
        assert out.dtype == jnp.float32

        ref_cd = jax.block_until_ready(reference_matched(x, params, jnp.bfloat16))
        ref_hi = jax.block_until_ready(reference_forward(x, params))
        err_cd = float(jnp.max(jnp.abs(out - ref_cd)))
        err_hi = float(jnp.max(jnp.abs(out - ref_hi)))
        # Tight vs. a precision-matched reference; loose vs. the f32 HIGHEST one
        # (bf16 input/weight traffic is the documented accuracy trade-off).
        assert err_cd < 5e-3, f"shape {(B,S,D,n_class)}: matched-ref err {err_cd}"
        assert err_hi < 5e-2, f"shape {(B,S,D,n_class)}: f32-ref err {err_hi}"

    print("KERNEL_OK")
</pallas_src>

<mosaic_0001>
module attributes {stable_mosaic.version = 11 : i64} {
  func.func @_mlp_kernel(%arg0: i32, %arg1: memref<8x128xbf16, #tpu.memory_space<vmem>>, %arg2: memref<128x128xbf16, #tpu.memory_space<vmem>>, %arg3: memref<1x128xf32, #tpu.memory_space<vmem>>, %arg4: memref<128x128xbf16, #tpu.memory_space<vmem>>, %arg5: memref<1x128xf32, #tpu.memory_space<vmem>>, %arg6: memref<128x10xbf16, #tpu.memory_space<vmem>>, %arg7: memref<1x10xf32, #tpu.memory_space<vmem>>, %arg8: memref<8x10xf32, #tpu.memory_space<vmem>>) attributes {dimension_semantics = [#tpu.dimension_semantics<parallel>], iteration_bounds = array<i64: 2>, scalar_prefetch = 0 : i64, scratch_operands = 0 : i64, tpu.core_type = #tpu.core_type<tc>, window_params = [{transform_indices = @transform_0, window_bounds = array<i64: 8, 128>}, {pipeline_mode = #tpu.pipeline_mode<synchronous>, transform_indices = @transform_1, window_bounds = array<i64: 128, 128>}, {pipeline_mode = #tpu.pipeline_mode<synchronous>, transform_indices = @transform_2, window_bounds = array<i64: 1, 128>}, {pipeline_mode = #tpu.pipeline_mode<synchronous>, transform_indices = @transform_3, window_bounds = array<i64: 128, 128>}, {pipeline_mode = #tpu.pipeline_mode<synchronous>, transform_indices = @transform_4, window_bounds = array<i64: 1, 128>}, {pipeline_mode = #tpu.pipeline_mode<synchronous>, transform_indices = @transform_5, window_bounds = array<i64: 128, 10>}, {pipeline_mode = #tpu.pipeline_mode<synchronous>, transform_indices = @transform_6, window_bounds = array<i64: 1, 10>}, {transform_indices = @transform_7, window_bounds = array<i64: 8, 10>}]} {
    %c0 = arith.constant 0 : index
    %c0_0 = arith.constant 0 : index
    %0 = vector.load %arg1[%c0, %c0_0] : memref<8x128xbf16, #tpu.memory_space<vmem>>, vector<8x128xbf16>
    %c0_1 = arith.constant 0 : index
    %c0_2 = arith.constant 0 : index
    %1 = vector.load %arg2[%c0_1, %c0_2] : memref<128x128xbf16, #tpu.memory_space<vmem>>, vector<128x128xbf16>
    %cst = arith.constant dense<0.000000e+00> : vector<8x128xf32>
    %2 = tpu.matmul %0, %1, %cst {dimension_numbers = #tpu.dot_dimension_numbers<[1], [0], [0], [1], [0, 0, 1, 1], [], []>} : vector<8x128xbf16>, vector<128x128xbf16>, vector<8x128xf32> -> vector<8x128xf32>
    %c0_3 = arith.constant 0 : index
    %c0_4 = arith.constant 0 : index
    %3 = vector.load %arg3[%c0_3, %c0_4] : memref<1x128xf32, #tpu.memory_space<vmem>>, vector<1x128xf32>
    %4 = vector.broadcast %3 : vector<1x128xf32> to vector<8x128xf32>
    %5 = arith.addf %2, %4 : vector<8x128xf32>
    %cst_5 = arith.constant 5.000000e-01 : f32
    %6 = vector.broadcast %cst_5 : f32 to vector<8x128xf32>
    %7 = arith.mulf %6, %5 : vector<8x128xf32>
    %cst_6 = arith.constant 0.707106769 : f32
    %8 = vector.broadcast %cst_6 : f32 to vector<8x128xf32>
    %9 = arith.mulf %5, %8 : vector<8x128xf32>
    %10 = math.erf %9 : vector<8x128xf32>
    %cst_7 = arith.constant 1.000000e+00 : f32
    %11 = vector.broadcast %cst_7 : f32 to vector<8x128xf32>
    %12 = arith.addf %11, %10 : vector<8x128xf32>
    %13 = arith.mulf %7, %12 : vector<8x128xf32>
    %14 = arith.truncf %13 : vector<8x128xf32> to vector<8x128xbf16>
    %c0_8 = arith.constant 0 : index
    %c0_9 = arith.constant 0 : index
    %15 = vector.load %arg4[%c0_8, %c0_9] : memref<128x128xbf16, #tpu.memory_space<vmem>>, vector<128x128xbf16>
    %cst_10 = arith.constant dense<0.000000e+00> : vector<8x128xf32>
    %16 = tpu.matmul %14, %15, %cst_10 {dimension_numbers = #tpu.dot_dimension_numbers<[1], [0], [0], [1], [0, 0, 1, 1], [], []>} : vector<8x128xbf16>, vector<128x128xbf16>, vector<8x128xf32> -> vector<8x128xf32>
    %c0_11 = arith.constant 0 : index
    %c0_12 = arith.constant 0 : index
    %17 = vector.load %arg5[%c0_11, %c0_12] : memref<1x128xf32, #tpu.memory_space<vmem>>, vector<1x128xf32>
    %18 = vector.broadcast %17 : vector<1x128xf32> to vector<8x128xf32>
    %19 = arith.addf %16, %18 : vector<8x128xf32>
    %cst_13 = arith.constant 5.000000e-01 : f32
    %20 = vector.broadcast %cst_13 : f32 to vector<8x128xf32>
    %21 = arith.mulf %20, %19 : vector<8x128xf32>
    %cst_14 = arith.constant 0.707106769 : f32
    %22 = vector.broadcast %cst_14 : f32 to vector<8x128xf32>
    %23 = arith.mulf %19, %22 : vector<8x128xf32>
    %24 = math.erf %23 : vector<8x128xf32>
    %cst_15 = arith.constant 1.000000e+00 : f32
    %25 = vector.broadcast %cst_15 : f32 to vector<8x128xf32>
    %26 = arith.addf %25, %24 : vector<8x128xf32>
    %27 = arith.mulf %21, %26 : vector<8x128xf32>
    %28 = arith.truncf %27 : vector<8x128xf32> to vector<8x128xbf16>
    %c0_16 = arith.constant 0 : index
    %c0_17 = arith.constant 0 : index
    %29 = vector.load %arg6[%c0_16, %c0_17] : memref<128x10xbf16, #tpu.memory_space<vmem>>, vector<128x10xbf16>
    %cst_18 = arith.constant dense<0.000000e+00> : vector<8x10xf32>
    %30 = tpu.matmul %28, %29, %cst_18 {dimension_numbers = #tpu.dot_dimension_numbers<[1], [0], [0], [1], [0, 0, 1, 1], [], []>} : vector<8x128xbf16>, vector<128x10xbf16>, vector<8x10xf32> -> vector<8x10xf32>
    %c0_19 = arith.constant 0 : index
    %c0_20 = arith.constant 0 : index
    %31 = vector.load %arg7[%c0_19, %c0_20] : memref<1x10xf32, #tpu.memory_space<vmem>>, vector<1x10xf32>
    %32 = vector.broadcast %31 : vector<1x10xf32> to vector<8x10xf32>
    %33 = arith.addf %30, %32 : vector<8x10xf32>
    %c0_21 = arith.constant 0 : index
    %c0_22 = arith.constant 0 : index
    %34 = vector.load %arg8[%c0_21, %c0_22] : memref<8x10xf32, #tpu.memory_space<vmem>>, vector<8x10xf32>
    tpu.vector_store %arg8[%c0_21, %c0_22], %33 {strides = array<i32>} : memref<8x10xf32, #tpu.memory_space<vmem>>, vector<8x10xf32>,
    return
  }
  func.func @transform_0(%arg0: i32) -> (i32, i32) {
    %c0_i32 = arith.constant 0 : i32
    %c0_i32_0 = arith.constant 0 : i32
    return %arg0, %c0_i32 : i32, i32
  }
  func.func @transform_1(%arg0: i32) -> (i32, i32) {
    %c0_i32 = arith.constant 0 : i32
    %c0_i32_0 = arith.constant 0 : i32
    %c0_i32_1 = arith.constant 0 : i32
    return %c0_i32, %c0_i32_0 : i32, i32
  }
  func.func @transform_2(%arg0: i32) -> (i32, i32) {
    %c0_i32 = arith.constant 0 : i32
    %c0_i32_0 = arith.constant 0 : i32
    %c0_i32_1 = arith.constant 0 : i32
    return %c0_i32, %c0_i32_0 : i32, i32
  }
  func.func @transform_3(%arg0: i32) -> (i32, i32) {
    %c0_i32 = arith.constant 0 : i32
    %c0_i32_0 = arith.constant 0 : i32
    %c0_i32_1 = arith.constant 0 : i32
    return %c0_i32, %c0_i32_0 : i32, i32
  }
  func.func @transform_4(%arg0: i32) -> (i32, i32) {
    %c0_i32 = arith.constant 0 : i32
    %c0_i32_0 = arith.constant 0 : i32
    %c0_i32_1 = arith.constant 0 : i32
    return %c0_i32, %c0_i32_0 : i32, i32
  }
  func.func @transform_5(%arg0: i32) -> (i32, i32) {
    %c0_i32 = arith.constant 0 : i32
    %c0_i32_0 = arith.constant 0 : i32
    %c0_i32_1 = arith.constant 0 : i32
    return %c0_i32, %c0_i32_0 : i32, i32
  }
  func.func @transform_6(%arg0: i32) -> (i32, i32) {
    %c0_i32 = arith.constant 0 : i32
    %c0_i32_0 = arith.constant 0 : i32
    %c0_i32_1 = arith.constant 0 : i32
    return %c0_i32, %c0_i32_0 : i32, i32
  }
  func.func @transform_7(%arg0: i32) -> (i32, i32) {
    %c0_i32 = arith.constant 0 : i32
    %c0_i32_0 = arith.constant 0 : i32
    return %arg0, %c0_i32 : i32, i32
  }
}

</mosaic_0001>

<bundles_post_ra>
// kernel: mlp_forward.1
= control target key start
LH: loop header
LB: loop body
LE: loop exit
PB: predicated region body
PF: predicated region fallthrough
CT: control target
= control target key end

     0   :  { %12 = vsyncpa [#allocation3], 0  ;;  %s1204_s0 = inlined_call_operand.vmem [shape: bf16[16,128], index: 0, kind: input, shape index: {}]   ;;  %s1205_s1 = inlined_call_operand.vmem [shape: bf16[128,128], index: 1, kind: input, shape index: {}]   ;;  %s1206_s2 = inlined_call_operand.vmem [shape: f32[1,128], index: 2, kind: input, shape index: {}]   ;;  %s1207_s3 = inlined_call_operand.vmem [shape: bf16[128,128], index: 3, kind: input, shape index: {}]   ;;  %s1208_s4 = inlined_call_operand.vmem [shape: f32[1,128], index: 4, kind: input, shape index: {}]   ;;  %s1209_s5 = inlined_call_operand.vmem [shape: bf16[128,10], index: 5, kind: input, shape index: {}]   ;;  %s1210_s6 = inlined_call_operand.vmem [shape: f32[1,10], index: 6, kind: input, shape index: {}]   ;;  %s1211_s7 = inlined_call_operand.hbm [shape: f32[16,10], index: 7, kind: output, shape index: {}]  }
   0x1   :  { %14 = vsyncpa [#allocation3 + $0x1], 0  ;;  %s994_s24 = smov 0   ;;  %s996_s25 = smov 0  }
   0x2   :  { %s998_s26 = smov 0   ;;  %s1000_s27 = smov 0  }
   0x3 LB: > { %s1015_s28 = sadd.s32 4294967295, %s949_s27   ;;  %s696_s29 = sadd.s32 4294967294, %s949_s27   ;;  %s949_s27 = sphi %s1000_s27, %s1217_s27   ;;  %s945_s26 = sphi %s998_s26, %s1216_s26   ;;  %s941_s25 = sphi %s996_s25, %s1215_s25   ;;  %s937_s24 = sphi %s994_s24, %s1214_s24  }
   0x4   : > { %s1019_s30 = sadd.s32 1, %s949_s27   ;;  %s179_s8 = sadd.s32 1, %s945_s26 }
   0x5   : > { %s176_s9 = ssub.s32 %s949_s27, %s1019_s30  ;;  %p189_p0 = scmp.ne.s32.totalorder %s945_s26, %s941_s25 }
   0x6   : > { %p177_p1 = scmp.eq.s32.totalorder %s176_s9, 0  ;;  %p190_p2 = scmp.eq.s32.totalorder %s1015_s28, 1 }
   0x7   : > { %p195_p3 = scmp.ne.s32.totalorder %s941_s25, %s937_s24  ;;  %p196_p4 = scmp.eq.s32.totalorder %s696_s29, 1 }
   0x8   : > { %s1030_s10 = scalar_select %p177_p1, %s945_s26, %s179_s8  }
   0x9   : > { %p1032_p5 = por %p190_p2, %p189_p0  ;;  %p1036_p6 = por %p196_p4, %p195_p3 }
   0xa   : > { %p699_p7 = scmp.ge.s32.totalorder %s949_s27, 1  ;;  %p239_p8 = scmp.lt.s32.totalorder %s949_s27, 3 }
   0xc   : > { %p240_p9 = pnand %p699_p7, %p239_p8 }
   0xd   : > { %p270_p10 = scmp.lt.s32.totalorder (!%p240_p9), %s1015_s28, 1  ;;  %s267_s14 = sand.u32 (!%p240_p9), 1, %s941_s25  }
   0xe   : > { %243 = sbr.rel (%p240_p9) target bundleno = 695 (0x2b7), region = 48  ;;  %s624_s29 = scalar_lea.sflag (!%p240_p9), [#allocation3], %s267_s14 }
   0xf   : > { %s953_s8 = smov (!%p240_p9), [#allocation2]  }
  0x10   : > { %s893_s9 = sshll.u32 (!%p240_p9), %s953_s8, 4  ;;  %s894_s9 = int_to_ptr.vmem [resolvable:$false] %s893_s9 }
  0x11   : > { %s895_s13 = scalar_lea.vmem (!%p240_p9), %s894_s9, 256 }
  0x13   : > { %v861_v0 = vld [vmem:[%s1205_s1 + $0x38] sm:$0xff]   ;;  %v951_v1 = vmov 0.0   ;;  %v862_v2 = vld [vmem:[%s1205_s1 + $0x30] sm:$0xff]   ;;  %vm952_vm0 = vmmov 0   ;;  %v863_v3 = vld [vmem:[%s1205_s1 + $0x28] sm:$0xff]   ;;  %s271_s15 = scalar_select %p270_p10, %s1015_s28, 1 }
  0x14   : > { %760 = vmatprep.subr.bf16.mxu0 %v951_v1  ;;  %780 = vmatprep.subr.bf16.mxu1 %v951_v1  ;;  %v869_v4 = vld [vmem:[%s1207_s3 + $0x38] sm:$0xff]   ;;  %v864_v5 = vld [vmem:[%s1205_s1 + $0x20] sm:$0xff]   ;;  %v870_v6 = vld [vmem:[%s1207_s3 + $0x30] sm:$0xff]   ;;  %vm621_vm1 = vcmask 80896  }
  0x15   : > { %761 = vmatpush3.bf16.msra.mxu0 %v861_v0  ;;  %776 = vmatprep.mubr.msk.bf16.mxu0 %vm952_vm0, %v951_v1  ;;  %v865_v7 = vld [vmem:[%s1205_s1 + $0x18] sm:$0xff]   ;;  %v866_v8 = vld [vmem:[%s1205_s1 + $0x10] sm:$0xff]   ;;  %v867_v9 = vld [vmem:[%s1205_s1 + $0x8] sm:$0xff]   ;;  %s701_s18 = sshll.u32 %s271_s15, 2  ;;  %s700_s15 = sshll.u32 %s267_s14, 3 }
  0x16   : > { %762 = vmatprep.subr.bf16.mxu0 %v951_v1  ;;  %796 = vmatprep.mubr.msk.bf16.mxu1 %vm952_vm0, %v951_v1  ;;  %v868_v10 = vld [vmem:[%s1205_s1] sm:$0xff]   ;;  %s273_s23 = scalar_lea.vmem %s1204_s0, %s701_s18  ;;  %v871_v12 = vld [vmem:[%s1207_s3 + $0x28] sm:$0xff]   ;;  %v873_v14 = vld [vmem:[%s1207_s3 + $0x18] sm:$0xff]   ;;  %s730_s18 = sshll.u32 %s1015_s28, 7 }
  0x17   : > { %781 = vmatpush3.bf16.msra.mxu1 %v869_v4  ;;  %v275_v11 = vld [vmem:[%s273_s23] sm:$0xf]  ;;  %v874_v15 = vld [vmem:[%s1207_s3 + $0x10] sm:$0xff]   ;;  %v875_v16 = vld [vmem:[%s1207_s3 + $0x8] sm:$0xff]   ;;  %s269_s19 = scalar_lea.vmem [#allocation2], %s700_s15  ;;  %s1163_s23 = scalar_lea.hbm %s1211_s7, %s730_s18 }
  0x18   : > { %782 = vmatprep.subr.bf16.mxu1 %v951_v1  ;;  %v872_v13 = vld [vmem:[%s1207_s3 + $0x20] sm:$0xff]   ;;  %v877_v18 = vld [vmem:[%s1209_s5 + $0x38] sm:$0xff]   ;;  %v878_v19 = vld [vmem:[%s1209_s5 + $0x30] sm:$0xff]   ;;  %s637_s20 = sshll.u32 %s269_s19, 4  ;;  %s1165_s20 = int_to_ptr.vmem [resolvable:$true] %s637_s20 }
  0x19   : > { %763 = vmatpush3.bf16.msra.mxu0 %v862_v2  ;;  %v876_v17 = vld [vmem:[%s1207_s3] sm:$0xff]   ;;  %v879_v32 = vld [vmem:[%s1209_s5 + $0x28] sm:$0xff]   ;;  %v881_v34 = vld [vmem:[%s1209_s5 + $0x18] sm:$0xff]   ;;  %s889_s28 = scalar_lea.vmem %s1165_s20, 128  ;;  %p896_p0 = scmp.lt.s32.totalorder %s1165_s20, %s894_s9 }
  0x1a   : > { %764 = vmatprep.subr.bf16.mxu0 %v951_v1  ;;  %v702_v20 = vld [vmem:[%s1206_s2] ss:$0 sm:$0xff]  ;;  %v882_v35 = vld [vmem:[%s1209_s5 + $0x10] sm:$0xff]   ;;  %v883_v36 = vld [vmem:[%s1209_s5 + $0x8] sm:$0xff]   ;;  %p890_p11 = scmp.ne.s32.totalorder %s1165_s20, %s889_s28  ;;  %p897_p1 = scmp.lt.s32.totalorder %s895_s13, %s889_s28 }
  0x1b   : > { %783 = vmatpush3.bf16.msra.mxu1 %v870_v6  ;;  %v880_v33 = vld [vmem:[%s1209_s5 + $0x20] sm:$0xff]  }
  0x1c   : > { %784 = vmatprep.subr.bf16.mxu1 %v951_v1  ;;  %v884_v37 = vld [vmem:[%s1209_s5] sm:$0xff]   ;;  %p891_p12 = pnand %p890_p11, %p1032_p5  ;;  %p898_p2 = por %p897_p1, %p896_p0 }
  0x1d   : > { %765 = vmatpush3.bf16.msra.mxu0 %v863_v3  ;;  %v711_v38 = vld [vmem:[%s1208_s4] ss:$0 sm:$0xff] }
  0x1e   : > { %766 = vmatprep.subr.bf16.mxu0 %v951_v1  ;;  %v720_v50 = vld [vmem:[%s1210_s6] ss:$0 sm:$0xff]  ;;  %p892_p13 = pneg %p891_p12 }
  0x1f   : > { %785 = vmatpush3.bf16.msra.mxu1 %v871_v12 }
  0x20   : > { %786 = vmatprep.subr.bf16.mxu1 %v951_v1  ;;  %p899_p3 = pnand %p898_p2, %p892_p13 }
  0x21   : > { %767 = vmatpush3.bf16.msra.mxu0 %v864_v5 }
  0x22   : > { %768 = vmatprep.subr.bf16.mxu0 %v951_v1 }
  0x23   : > { %787 = vmatpush3.bf16.msra.mxu1 %v872_v13 }
  0x24   : > { %788 = vmatprep.subr.bf16.mxu1 %v951_v1 }
  0x25   : > { %769 = vmatpush3.bf16.msra.mxu0 %v865_v7 }
  0x26   : > { %770 = vmatprep.subr.bf16.mxu0 %v951_v1 }
  0x27   : > { %789 = vmatpush3.bf16.msra.mxu1 %v873_v14 }
  0x28   : > { %790 = vmatprep.subr.bf16.mxu1 %v951_v1 }
  0x29   : > { %771 = vmatpush3.bf16.msra.mxu0 %v866_v8 }
  0x2a   : > { %772 = vmatprep.subr.bf16.mxu0 %v951_v1 }
  0x2b   : > { %791 = vmatpush3.bf16.msra.mxu1 %v874_v15 }
  0x2c   : > { %792 = vmatprep.subr.bf16.mxu1 %v951_v1 }
  0x2d   : > { %773 = vmatpush3.bf16.msra.mxu0 %v867_v9 }
  0x2e   : > { %774 = vmatprep.subr.bf16.mxu0 %v951_v1 }
  0x2f   : > { %793 = vmatpush3.bf16.msra.mxu1 %v875_v16 }
  0x30   : > { %794 = vmatprep.subr.bf16.mxu1 %v951_v1 }
  0x31   : > { %775 = vmatpush3.bf16.msra.mxu0 %v868_v10 }
  0x32   : > { %800 = vmatprep.subr.bf16.mxu0 %v951_v1 }
  0x33   : > { %795 = vmatpush3.bf16.msra.mxu1 %v876_v17 }
  0x34   : > { %777 = vmatmul.mubr.bf16.vlgmr.msra.gmra.mxu0 %v275_v11 }
  0x35   : > { %816 = vmatprep.mubr.msk.bf16.mxu0 %vm952_vm0, %v951_v1  ;;  %801 = vmatpush3.bf16.msra.mxu0 %v877_v18 }
  0x36   : > { %802 = vmatprep.subr.bf16.mxu0 %v951_v1 }
  0x39   : > { %803 = vmatpush3.bf16.msra.mxu0 %v878_v19 }
  0x3a   : > { %804 = vmatprep.subr.bf16.mxu0 %v951_v1 }
  0x3d   : > { %805 = vmatpush3.bf16.msra.mxu0 %v879_v32 }
  0x3e   : > { %806 = vmatprep.subr.bf16.mxu0 %v951_v1 }
  0x41   : > { %807 = vmatpush3.bf16.msra.mxu0 %v880_v33 }
  0x42   : > { %808 = vmatprep.subr.bf16.mxu0 %v951_v1 }
  0x45   : > { %809 = vmatpush3.bf16.msra.mxu0 %v881_v34 }
  0x46   : > { %810 = vmatprep.subr.bf16.mxu0 %v951_v1 }
  0x49   : > { %811 = vmatpush3.bf16.msra.mxu0 %v882_v35 }
  0x4a   : > { %812 = vmatprep.subr.bf16.mxu0 %v951_v1 }
  0x4d   : > { %813 = vmatpush3.bf16.msra.mxu0 %v883_v36 }
  0x4e   : > { %814 = vmatprep.subr.bf16.mxu0 %v951_v1 }
  0x51   : > { %815 = vmatpush3.bf16.msra.mxu0 %v884_v37 }
  0xf4   : > { %v381_v21 = vpop.f32.mrf.mxu0 }
  0xf5   : > { %v382_v22 = vadd.f32 %v702_v20, %v381_v21 }
  0xf6   : > { %v778_v23 = vpop.f32.mrf.mxu0 }
  0xf7   : > { %v388_v24 = vmul.f32 0.70710677, %v382_v22  ;;  %v387_v28 = vmul.f32 0.5, %v382_v22 }
  0xf8   : > { %v384_v25 = vpop.f32.mrf.mxu0 }
  0xf9   : > { %885 = verf.f32 %v388_v24 }
  0xfa   : > { %v779_v26 = vpop.f32.mrf.mxu0 }
 0x106   : > { %v886_v27 = vpop.eup %885 }
 0x107   : > { %v390_v29 = vadd.f32 1.0, %v886_v27 }
 0x109   : > { %v391_v30 = vmul.f32 %v390_v29, %v387_v28 }
 0x10b   : > { %v392_v31 = vpack.c.bf16 %v391_v30, %v391_v30 }
 0x10d   : > { %797 = vmatmul.mubr.bf16.vlgmr.msra.gmra.mxu1 %v392_v31 }
 0x1cd   : > { %v498_v39 = vpop.f32.mrf.mxu1 }
 0x1ce   : > { %v499_v40 = vadd.f32 %v711_v38, %v498_v39 }
 0x1cf   : > { %v798_v41 = vpop.f32.mrf.mxu1 }
 0x1d0   : > { %v505_v42 = vmul.f32 0.70710677, %v499_v40  ;;  %v504_v46 = vmul.f32 0.5, %v499_v40 }
 0x1d1   : > { %v501_v43 = vpop.f32.mrf.mxu1 }
 0x1d2   : > { %887 = verf.f32 %v505_v42 }
 0x1d3   : > { %v799_v44 = vpop.f32.mrf.mxu1 }
 0x1df   : > { %v888_v45 = vpop.eup %887 }
 0x1e0   : > { %v507_v47 = vadd.f32 1.0, %v888_v45 }
 0x1e2   : > { %v508_v48 = vmul.f32 %v507_v47, %v504_v46 }
 0x1e4   : > { %v509_v49 = vpack.c.bf16 %v508_v48, %v508_v48 }
 0x1e6   : > { %817 = vmatmul.mubr.bf16.vlgmr.msra.gmra.mxu0 %v509_v49 }
 0x2a6   : > { %v615_v51 = vpop.f32.mrf.mxu0 }
 0x2a7   : > { %v616_v52 = vadd.f32 %v720_v50, %v615_v51 }
 0x2a8   : > { %v818_v53 = vpop.f32.mrf.mxu0 }
 0x2a9   : > { %622 = vst.msk [vmem:[%s269_s19] sm:$0xff] %vm621_vm1, %v616_v52 }
 0x2aa   : > { %v618_v54 = vpop.f32.mrf.mxu0 }
 0x2ab   : > { %902 = shalt.err (!%p899_p3)
}
 0x2ac   : > { %s903_s15 = scalar_lea.hbm %s1163_s23, 128  ;;  %s907_s17 = scalar_lea.hbm %s1211_s7, 256 }
 0x2ad   : > { %p904_p4 = scmp.ne.s32.totalorder %s1163_s23, %s903_s15  ;;  %p908_p9 = scmp.lt.s32.totalorder %s1163_s23, %s1211_s7 }
 0x2ae   : > { %p909_p10 = scmp.lt.s32.totalorder %s907_s17, %s903_s15 }
 0x2af   : > { %p905_p7 = pnand %p904_p4, %p1032_p5 }
 0x2b0   : > { %p910_p11 = por %p909_p10, %p908_p9 }
 0x2b1   : > { %p906_p8 = pneg %p905_p7 }
 0x2b3   : > { %p911_p12 = pnand %p910_p11, %p906_p8 }
 0x2b5   : > { %914 = shalt.err (!%p911_p12)
}
 0x2b6   : > { %820 = dma.vmem_to_hbm [thread:$0]  (%p1032_p5), %s1165_s20, 128, %s1163_s23, %s624_s29   ;;  %v819_v55 = vpop.f32.mrf.mxu0 }
 0x2b7 PF: > { %p826_p13 = scmp.ge.s32.totalorder %s949_s27, 2  ;;  %s649_s21 = sand.u32 1, %s937_s24  }
 0x2b8   : > { %s650_s22 = scalar_lea.sflag [#allocation3], %s649_s21 }
 0x2b9   : > { %p823_p0 = pnand %p826_p13, %p1036_p6 }
 0x2bb   : > { %p824_p1 = pneg %p823_p0 }
 0x2bd   : > { %932 = dma.done.wait (%p824_p1), %s650_s22, 128  }
 0x2be   : > { %934 = vsyncadd (%p824_p1), %s650_s22, 4294967168  ;;  %p17_p2 = scmp.ge.s32.totalorder %s1019_s30, 4   ;;  %s1214_s24 = smov %s941_s25 }
 0x2bf   : > { %s1215_s25 = smov %s945_s26  ;;  %s1216_s26 = smov %s1030_s10 }
 0x2c0   : > { %s1217_s27 = smov %s1019_s30  ;;  %19 = sbr.rel (!%p17_p2) target bundleno = 3 (0x3), region = 83 }
 0x2c5   :  { %655 = vsyncpa [#allocation3], 1 }
 0x2c6   :  { %657 = vsyncpa [#allocation3 + $0x1], 1 }

</bundles_post_ra>
